<compile_context>
chip_gen: v7x
topology: tpu7x:2x2x1
jax: 0.10.0
libtpu: 0.0.40
codegen_flags: <defaults>
</compile_context>

<pallas_src>
import functools

import jax
import jax.numpy as jnp
from jax import lax
from jax.experimental import pallas as pl
from jax.experimental.pallas import tpu as pltpu

_V_CHUNK = 512           # vocab entries processed per in-kernel chunk
_ROW_TILE_TARGET = 512   # rows per grid step (good for v5e/v6e, <= v7x cap)


def _round_up(x, m):
    return (x + m - 1) // m * m


def _choose_rows(n_rows, target=_ROW_TILE_TARGET):
    """Pick (row_tile, padded_rows).

    Preference: a tile that divides n_rows exactly (no padding -> no
    post-kernel slice copy), then >=2 grid steps (so the "parallel" axis can
    shard across both v7x TensorCores), then multiples of 128 rows (full MXU M
    passes), then the largest such tile.  Falls back to padding only when no
    legal divisor exists.
    """
    if n_rows <= 8:
        return n_rows, n_rows
    best = None
    cap = min(target, n_rows)
    for r in range(cap, 7, -1):
        if n_rows % r:
            continue
        if r % 8 and r != n_rows:
            continue                       # (8, 128) sublane tiling legality
        key = ((n_rows // r) >= 2, r % 128 == 0, r)
        if best is None or key > best[0]:
            best = (key, r)
    if best is not None:
        return best[1], n_rows
    rows = min(target, _round_up(n_rows, 8))
    return rows, _round_up(n_rows, rows)


def _vmem_budget_bytes():
    try:
        return int(pltpu.get_tpu_info().vmem_capacity_bytes * 0.75)
    except Exception:
        return 48 * 1024 * 1024            # conservative (v7x: 64 MiB / TC)


def _onehot_dot(idx_col, table_ref, v_chunk):
    """sum_c onehot(idx, chunk_c) @ table[chunk_c]  -> (rows, D) float32."""
    v, _ = table_ref.shape
    rows = idx_col.shape[0]
    acc = None
    for c0 in range(0, v, v_chunk):        # static unroll over vocab chunks
        vc = min(v_chunk, v - c0)
        iota = lax.broadcasted_iota(jnp.int32, (rows, vc), 1) + c0
        onehot = (iota == idx_col).astype(table_ref.dtype)
        part = jnp.dot(onehot, table_ref[c0:c0 + vc, :],
                       preferred_element_type=jnp.float32)
        acc = part if acc is None else acc + part
    return acc


def _glove_cat_kernel(idx_ref, table_ref, out_ref, *, v_chunk):
    # idx_ref: (rows, F) int32 ; table_ref: (V, D) ; out_ref: (rows, F*D)
    _, n_feat = idx_ref.shape
    _, dim = table_ref.shape
    idx = idx_ref[...]
    for f in range(n_feat):                # static unroll over features
        emb = _onehot_dot(idx[:, f:f + 1], table_ref, v_chunk)
        # Per-feature store into the resident VMEM output block -- final
        # layout, no concatenate copy, one accumulator live at a time.
        out_ref[:, f * dim:(f + 1) * dim] = emb.astype(out_ref.dtype)


def _glove_agg_kernel(idx_ref, table_ref, out_ref, *, scale, v_chunk):
    # idx_ref: (rows, F) int32 ; table_ref: (V, D) ; out_ref: (rows, D)
    rows, n_feat = idx_ref.shape
    v, _ = table_ref.shape
    idx = idx_ref[...]
    acc = None
    for c0 in range(0, v, v_chunk):        # static unroll over vocab chunks
        vc = min(v_chunk, v - c0)
        iota = lax.broadcasted_iota(jnp.int32, (rows, vc), 1) + c0
        # Multi-hot count matrix in int32; counts <= F are exact in any float
        # dtype, so counts @ table == sum_f table[idx_f] after one cast.
        counts = (iota == idx[:, 0:1]).astype(jnp.int32)
        for f in range(1, n_feat):
            counts += (iota == idx[:, f:f + 1]).astype(jnp.int32)
        part = jnp.dot(counts.astype(table_ref.dtype),
                       table_ref[c0:c0 + vc, :],
                       preferred_element_type=jnp.float32)
        acc = part if acc is None else acc + part
    if scale != 1.0:
        acc = acc * scale                  # mean: 1/F folded as constant mul
    out_ref[...] = acc.astype(out_ref.dtype)


def trx_encoder_glove(indices, table, seq_lens, agg_type="cat"):
    """indices: (F, B, T) int, table: (V, D).

    Returns (payload, seq_lens), mirroring PaddedBatch(out, x.seq_lens).
    """
    n_feat, batch, seq = indices.shape
    vocab, dim = table.shape
    n_rows = batch * seq
    out_cols = n_feat * dim if agg_type == "cat" else dim

    # (F, B, T) -> (B*T, F): rows on sublanes, features along lanes, so each
    # per-feature index read inside the kernel is a cheap lane splat.
    idx2d = jnp.transpose(indices.reshape(n_feat, n_rows)).astype(jnp.int32)

    rows, n_pad = _choose_rows(n_rows)
    if n_pad != n_rows:
        # Padded rows gather vocab id 0 and are sliced off afterwards.
        idx2d = jnp.pad(idx2d, ((0, n_pad - n_rows), (0, 0)))

    grid = (n_pad // rows,)
    idx_spec = pl.BlockSpec((rows, n_feat), lambda r: (r, 0))
    # Table block index is constant -> DMA'd once per core.
    tbl_spec = pl.BlockSpec((vocab, dim), lambda r: (0, 0))
    out_spec = pl.BlockSpec((rows, out_cols), lambda r: (r, 0))
    # TODO(synk): if dim (or F*dim) is not a multiple of 128, padding the
    # embedding dim to the next multiple of 128 makes output stores unmasked;
    # skipped here to avoid the post-kernel column-strip copy.

    v_chunk = min(_V_CHUNK, vocab)
    itemsize = jnp.dtype(table.dtype).itemsize
    need = (2 * vocab * dim * itemsize           # table (double-buffered)
            + 2 * rows * n_feat * 4              # index blocks
            + 2 * rows * out_cols * itemsize     # output blocks
            + 2 * rows * v_chunk * 4             # one-hot / counts chunk
            + 2 * rows * dim * 4)                # f32 accumulator headroom
    vmem_limit = int(max(32 * 1024 * 1024,
                         min(_vmem_budget_bytes(), 2 * need)))
    cparams = pltpu.CompilerParams(
        dimension_semantics=("parallel",),
        vmem_limit_bytes=vmem_limit,
    )

    if agg_type == "cat":
        kernel = functools.partial(_glove_cat_kernel, v_chunk=v_chunk)
    else:
        scale = 1.0 if agg_type == "sum" else 1.0 / n_feat
        kernel = functools.partial(_glove_agg_kernel, scale=scale,
                                   v_chunk=v_chunk)

    out = pl.pallas_call(
        kernel,
        out_shape=jax.ShapeDtypeStruct((n_pad, out_cols), table.dtype),
        grid_spec=pltpu.PrefetchScalarGridSpec(
            num_scalar_prefetch=0,
            grid=grid,
            in_specs=[idx_spec, tbl_spec],
            out_specs=out_spec,
        ),
        compiler_params=cparams,
    )(idx2d, table)

    if n_pad != n_rows:
        out = out[:n_rows]
    out = out.reshape(batch, seq, out_cols)
    return out, seq_lens


def _reference(indices, table, agg_type):
    # Pure-JAX reference of the PyTorch forward.
    embs = table[indices]                        # (F, B, T, D)
    if agg_type == "cat":
        f, b, t, d = embs.shape
        return jnp.transpose(embs, (1, 2, 0, 3)).reshape(b, t, f * d)
    s = embs.sum(axis=0)
    if agg_type == "sum":
        return s
    return s / indices.shape[0]


if __name__ == "__main__":
    # Small deterministic setup: F=3 features, vocab V=16, embedding dim D=32,
    # batch B=2, seq length T=8.
    F, V, D, B, T = 3, 16, 32, 2, 8
    key = jax.random.PRNGKey(0)
    k_tbl, k_idx, k_len = jax.random.split(key, 3)

    table = jax.random.normal(k_tbl, (V, D), dtype=jnp.float32)
    indices = jax.random.randint(k_idx, (F, B, T), 0, V, dtype=jnp.int32)
    seq_lens = jax.random.randint(k_len, (B,), 1, T + 1, dtype=jnp.int32)

    ok = True
    for agg in ("cat", "sum", "mean"):
        out, lens = trx_encoder_glove(indices, table, seq_lens, agg_type=agg)
        out = jax.block_until_ready(out)
        ref = _reference(indices, table, agg)
        if out.shape != ref.shape or not jnp.allclose(out, ref,
                                                      atol=1e-5, rtol=1e-5):
            ok = False
            print(f"MISMATCH for agg_type={agg}")

    if ok:
        print("KERNEL_OK")
</pallas_src>

<mosaic_0001>
module attributes {stable_mosaic.version = 11 : i64} {
  func.func @_glove_cat_kernel(%arg0: i32, %arg1: memref<8x3xi32, #tpu.memory_space<vmem>>, %arg2: memref<16x32xf32, #tpu.memory_space<vmem>>, %arg3: memref<8x96xf32, #tpu.memory_space<vmem>>) attributes {dimension_semantics = [#tpu.dimension_semantics<parallel>], iteration_bounds = array<i64: 2>, scalar_prefetch = 0 : i64, scratch_operands = 0 : i64, tpu.core_type = #tpu.core_type<tc>, window_params = [{transform_indices = @transform_0, window_bounds = array<i64: 8, 3>}, {pipeline_mode = #tpu.pipeline_mode<synchronous>, transform_indices = @transform_1, window_bounds = array<i64: 16, 32>}, {transform_indices = @transform_2, window_bounds = array<i64: 8, 96>}]} {
    %c0 = arith.constant 0 : index
    %c0_0 = arith.constant 0 : index
    %0 = vector.load %arg1[%c0, %c0_0] : memref<8x3xi32, #tpu.memory_space<vmem>>, vector<8x3xi32>
    %1 = vector.extract_strided_slice %0 {offsets = [0, 0], sizes = [8, 1], strides = [1, 1]} : vector<8x3xi32> to vector<8x1xi32>
    %2 = tpu.iota {dimensions = array<i32: 1>} : vector<8x16xi32>
    %c0_i32 = arith.constant 0 : i32
    %3 = vector.broadcast %c0_i32 : i32 to vector<8x16xi32>
    %4 = arith.addi %2, %3 : vector<8x16xi32>
    %5 = vector.broadcast %1 : vector<8x1xi32> to vector<8x16xi32>
    %6 = arith.cmpi eq, %4, %5 : vector<8x16xi32>
    %7 = arith.extui %6 : vector<8x16xi1> to vector<8x16xi32>
    %8 = arith.sitofp %7 : vector<8x16xi32> to vector<8x16xf32>
    %c0_1 = arith.constant 0 : index
    %c0_2 = arith.constant 0 : index
    %9 = vector.load %arg2[%c0_1, %c0_2] : memref<16x32xf32, #tpu.memory_space<vmem>>, vector<16x32xf32>
    %cst = arith.constant dense<0.000000e+00> : vector<8x32xf32>
    %10 = tpu.matmul %8, %9, %cst {dimension_numbers = #tpu.dot_dimension_numbers<[1], [0], [0], [1], [0, 0, 1, 1], [], []>} : vector<8x16xf32>, vector<16x32xf32>, vector<8x32xf32> -> vector<8x32xf32>
    %c0_3 = arith.constant 0 : index
    %c0_4 = arith.constant 0 : index
    %11 = vector.load %arg3[%c0_3, %c0_4] : memref<8x96xf32, #tpu.memory_space<vmem>>, vector<8x32xf32>
    tpu.vector_store %arg3[%c0_3, %c0_4], %10 {strides = array<i32>} : memref<8x96xf32, #tpu.memory_space<vmem>>, vector<8x32xf32>,
    %12 = vector.extract_strided_slice %0 {offsets = [0, 1], sizes = [8, 1], strides = [1, 1]} : vector<8x3xi32> to vector<8x1xi32>
    %13 = tpu.iota {dimensions = array<i32: 1>} : vector<8x16xi32>
    %c0_i32_5 = arith.constant 0 : i32
    %14 = vector.broadcast %c0_i32_5 : i32 to vector<8x16xi32>
    %15 = arith.addi %13, %14 : vector<8x16xi32>
    %16 = vector.broadcast %12 : vector<8x1xi32> to vector<8x16xi32>
    %17 = arith.cmpi eq, %15, %16 : vector<8x16xi32>
    %18 = arith.extui %17 : vector<8x16xi1> to vector<8x16xi32>
    %19 = arith.sitofp %18 : vector<8x16xi32> to vector<8x16xf32>
    %c0_6 = arith.constant 0 : index
    %c0_7 = arith.constant 0 : index
    %20 = vector.load %arg2[%c0_6, %c0_7] : memref<16x32xf32, #tpu.memory_space<vmem>>, vector<16x32xf32>
    %cst_8 = arith.constant dense<0.000000e+00> : vector<8x32xf32>
    %21 = tpu.matmul %19, %20, %cst_8 {dimension_numbers = #tpu.dot_dimension_numbers<[1], [0], [0], [1], [0, 0, 1, 1], [], []>} : vector<8x16xf32>, vector<16x32xf32>, vector<8x32xf32> -> vector<8x32xf32>
    %c0_9 = arith.constant 0 : index
    %c32 = arith.constant 32 : index
    %22 = vector.load %arg3[%c0_9, %c32] : memref<8x96xf32, #tpu.memory_space<vmem>>, vector<8x32xf32>
    tpu.vector_store %arg3[%c0_9, %c32], %21 {strides = array<i32>} : memref<8x96xf32, #tpu.memory_space<vmem>>, vector<8x32xf32>,
    %23 = vector.extract_strided_slice %0 {offsets = [0, 2], sizes = [8, 1], strides = [1, 1]} : vector<8x3xi32> to vector<8x1xi32>
    %24 = tpu.iota {dimensions = array<i32: 1>} : vector<8x16xi32>
    %c0_i32_10 = arith.constant 0 : i32
    %25 = vector.broadcast %c0_i32_10 : i32 to vector<8x16xi32>
    %26 = arith.addi %24, %25 : vector<8x16xi32>
    %27 = vector.broadcast %23 : vector<8x1xi32> to vector<8x16xi32>
    %28 = arith.cmpi eq, %26, %27 : vector<8x16xi32>
    %29 = arith.extui %28 : vector<8x16xi1> to vector<8x16xi32>
    %30 = arith.sitofp %29 : vector<8x16xi32> to vector<8x16xf32>
    %c0_11 = arith.constant 0 : index
    %c0_12 = arith.constant 0 : index
    %31 = vector.load %arg2[%c0_11, %c0_12] : memref<16x32xf32, #tpu.memory_space<vmem>>, vector<16x32xf32>
    %cst_13 = arith.constant dense<0.000000e+00> : vector<8x32xf32>
    %32 = tpu.matmul %30, %31, %cst_13 {dimension_numbers = #tpu.dot_dimension_numbers<[1], [0], [0], [1], [0, 0, 1, 1], [], []>} : vector<8x16xf32>, vector<16x32xf32>, vector<8x32xf32> -> vector<8x32xf32>
    %c0_14 = arith.constant 0 : index
    %c64 = arith.constant 64 : index
    %33 = vector.load %arg3[%c0_14, %c64] : memref<8x96xf32, #tpu.memory_space<vmem>>, vector<8x32xf32>
    tpu.vector_store %arg3[%c0_14, %c64], %32 {strides = array<i32>} : memref<8x96xf32, #tpu.memory_space<vmem>>, vector<8x32xf32>,
    return
  }
  func.func @transform_0(%arg0: i32) -> (i32, i32) {
    %c0_i32 = arith.constant 0 : i32
    %c0_i32_0 = arith.constant 0 : i32
    return %arg0, %c0_i32 : i32, i32
  }
  func.func @transform_1(%arg0: i32) -> (i32, i32) {
    %c0_i32 = arith.constant 0 : i32
    %c0_i32_0 = arith.constant 0 : i32
    %c0_i32_1 = arith.constant 0 : i32
    return %c0_i32, %c0_i32_0 : i32, i32
  }
  func.func @transform_2(%arg0: i32) -> (i32, i32) {
    %c0_i32 = arith.constant 0 : i32
    %c0_i32_0 = arith.constant 0 : i32
    return %arg0, %c0_i32 : i32, i32
  }
}

</mosaic_0001>

<bundles_post_ra>
// kernel: tpu_custom_call.1
= control target key start
LH: loop header
LB: loop body
LE: loop exit
PB: predicated region body
PF: predicated region fallthrough
CT: control target
= control target key end

     0   :  { %7 = vsyncpa [#allocation3], 0  ;;  %s776_s0 = inlined_call_operand.vmem [shape: s32[16,3], index: 0, kind: input, shape index: {}]   ;;  %s777_s1 = inlined_call_operand.vmem [shape: f32[16,32], index: 1, kind: input, shape index: {}]   ;;  %s778_s2 = inlined_call_operand.hbm [shape: f32[16,96], index: 2, kind: output, shape index: {}]  }
   0x1   :  { %9 = vsyncpa [#allocation3 + $0x1], 0  ;;  %s667_s9 = smov 0   ;;  %s669_s10 = smov 0  }
   0x2   :  { %s671_s11 = smov 0   ;;  %s673_s12 = smov 0  }
   0x3 LB: > { %s688_s13 = sadd.s32 4294967295, %s641_s12   ;;  %s473_s14 = sadd.s32 4294967294, %s641_s12   ;;  %s641_s12 = sphi %s673_s12, %s784_s12   ;;  %s637_s11 = sphi %s671_s11, %s783_s11   ;;  %s633_s10 = sphi %s669_s10, %s782_s10   ;;  %s629_s9 = sphi %s667_s9, %s781_s9  }
   0x4   : > { %s692_s15 = sadd.s32 1, %s641_s12   ;;  %s69_s16 = sadd.s32 1, %s637_s11 }
   0x5   : > { %s66_s17 = ssub.s32 %s641_s12, %s692_s15  ;;  %p79_p0 = scmp.ne.s32.totalorder %s637_s11, %s633_s10 }
   0x6   : > { %p67_p1 = scmp.eq.s32.totalorder %s66_s17, 0  ;;  %p80_p2 = scmp.eq.s32.totalorder %s688_s13, 1 }
   0x7   : > { %p85_p3 = scmp.ne.s32.totalorder %s633_s10, %s629_s9  ;;  %p86_p4 = scmp.eq.s32.totalorder %s473_s14, 1 }
   0x8   : > { %s703_s18 = scalar_select %p67_p1, %s637_s11, %s69_s16  }
   0x9   : > { %p705_p5 = por %p80_p2, %p79_p0  ;;  %p709_p6 = por %p86_p4, %p85_p3 }
   0xa   : > { %p476_p7 = scmp.ge.s32.totalorder %s641_s12, 1  ;;  %p114_p8 = scmp.lt.s32.totalorder %s641_s12, 3 }
   0xc   : > { %p115_p9 = pnand %p476_p7, %p114_p8 }
   0xd   : > { %p135_p10 = scmp.lt.s32.totalorder (!%p115_p9), %s688_s13, 1  ;;  %v148_v0 = vld [vmem:[%s777_s1] sm:$0xff] (!%p115_p9)  ;;  %v643_v1 = vmov (!%p115_p9), 0   ;;  %v644_v2 = vmov (!%p115_p9), 2   ;;  %v149_v3 = vld [vmem:[%s777_s1 + $0x8] sm:$0xff] (!%p115_p9)  ;;  %v645_v4 = vmov (!%p115_p9), 0.0|0.0   ;;  %v140_v9 = vlaneseq (!%p115_p9) }
   0xe   : > { %118 = sbr.rel (%p115_p9) target bundleno = 506 (0x1fa), region = 28  ;;  %575 = vset.pattern.permute.xlu0 (!%p115_p9), %v643_v1  ;;  %577 = vset.pattern.permute.xlu1 (!%p115_p9), %v644_v2  ;;  %v520_v5 = vpack.c.bf16 (!%p115_p9), %v149_v3, %v148_v0  ;;  %vm646_vm0 = vmmov (!%p115_p9), 0   ;;  %v647_v7 = vmov (!%p115_p9), 0.0   ;;  %v648_v8 = vmov (!%p115_p9), 1   ;;  %s132_s30 = sand.u32 (!%p115_p9), 1, %s633_s10  }
   0xf   : > { %519 = vmatprep.subr.bf16.mxu0 (!%p115_p9), %v645_v4  ;;  %522 = vmatprep.subr.bf16.mxu1 (!%p115_p9), %v645_v4  ;;  %v141_v10 = vand.u32 (!%p115_p9), 127, %v140_v9  ;;  %vm150_vm1 = vcmask (!%p115_p9), 130048   ;;  %s477_s3 = sshll.u32 (!%p115_p9), %s132_s30, 3  ;;  %vm224_vm5 = vcmask (!%p115_p9), 261120   ;;  %s649_s5 = smov (!%p115_p9), 32   ;;  %vm311_vm6 = vcmask (!%p115_p9), 523520  }
  0x10   : > { %521 = vmatpush3.bf16.msra.mxu0 (!%p115_p9), %v520_v5  ;;  %524 = vmatpush3.bf16.msra.mxu1 (!%p115_p9), %v520_v5  ;;  %s134_s4 = scalar_lea.vmem (!%p115_p9), [#allocation2], %s477_s3  ;;  %s650_s6 = smov (!%p115_p9), 64   ;;  %vm398_vm7 = vcmask (!%p115_p9), 785920  }
  0x11   : > { %525 = vmatprep.subr.bf16.mxu0 (!%p115_p9), %v645_v4  ;;  %502 = vmatprep.mubr.msk.f32.mxu0 (!%p115_p9), %vm646_vm0, %v647_v7  ;;  %s486_s7 = sshll.u32 (!%p115_p9), %s688_s13, 7  ;;  %s414_s8 = sshll.u32 (!%p115_p9), %s134_s4, 4  ;;  %s736_s8 = int_to_ptr.vmem [resolvable:$true] %s414_s8 }
  0x12   : > { %509 = vmatprep.mubr.msk.f32.mxu1 (!%p115_p9), %vm646_vm0, %v647_v7  ;;  %s734_s17 = scalar_lea.hbm (!%p115_p9), %s778_s2, %s486_s7  ;;  %s401_s21 = scalar_lea.sflag (!%p115_p9), [#allocation3], %s132_s30 }
  0x13   : > { %s579_s22 = scalar_lea.vmem (!%p115_p9), %s736_s8, 128 }
  0x14   : > { %p580_p11 = scmp.ne.s32.totalorder (!%p115_p9), %s736_s8, %s579_s22 }
  0x15   : > { %s136_s25 = scalar_select %p135_p10, %s688_s13, 1 }
  0x16   : > { %p581_p12 = pnand %p580_p11, %p705_p5  ;;  %s651_s13 = smov [#allocation2]  }
  0x17   : > { %s478_s26 = sshll.u32 %s136_s25, 3  ;;  %s583_s23 = sshll.u32 %s651_s13, 4  ;;  %s584_s23 = int_to_ptr.vmem [resolvable:$false] %s583_s23 }
  0x18   : > { %s138_s29 = scalar_lea.vmem %s776_s0, %s478_s26  ;;  %p582_p13 = pneg %p581_p12 }
  0x19   : > { %v139_v6 = vld [vmem:[%s138_s29] sm:$0xff]  ;;  %s585_s24 = scalar_lea.vmem %s584_s23, 256  ;;  %p586_p0 = scmp.lt.s32.totalorder %s736_s8, %s584_s23 }
  0x1a   : > { %143 = vperm.xlu0 %575, %v139_v6   ;;  %314 = vperm.xlu1 %577, %v139_v6   ;;  %p587_p1 = scmp.lt.s32.totalorder %s585_s24, %s579_s22 }
  0x1c   : > { %p588_p2 = por %p587_p1, %p586_p0 }
  0x1e   : > { %576 = vset.pattern.permute.xlu0 %v648_v8  ;;  %p589_p3 = pnand %p588_p2, %p582_p13 }
  0x1f   : > { %227 = vperm.xlu0 %576, %v139_v6  }
  0x23   : > { %578 = vset.pattern.permute.xlu0 %v644_v2 }
  0x99   : > { %v144_v11 = vpop.permute.xlu0 %143  ;;  %v315_v12 = vpop.permute.xlu1 %314 }
  0x9a   : > { %vm145_vm2 = vcmp.eq.s32.totalorder %v141_v10, %v144_v11  ;;  %vm316_vm3 = vcmp.eq.s32.totalorder %v141_v10, %v315_v12 }
  0x9b   : > { %v479_v13 = vsel %vm145_vm2, 1.0, %v647_v7  ;;  %v483_v14 = vsel %vm316_vm3, 1.0, %v647_v7 }
  0x9c   : > { %503 = vmatmul.mubr.msk.f32.vlgmr.msra.gmra.mrb[0].mxu0 %vm150_vm1, %v479_v13 }
  0x9d   : > { %527 = vmatpush3.bf16.msra.mxu0 %v520_v5  ;;  %516 = vmatprep.mubr.msk.f32.mxu0 %vm646_vm0, %v647_v7 }
  0x9e   : > { %v228_v15 = vpop.permute.xlu0 %227 }
  0x9f   : > { %vm229_vm4 = vcmp.eq.s32.totalorder %v141_v10, %v228_v15 }
  0xa0   : > { %v481_v16 = vsel %vm229_vm4, 1.0, %v647_v7  ;;  %517 = vmatmul.mubr.msk.f32.vlgmr.msra.gmra.mrb[2].mxu0 %vm150_vm1, %v483_v14 }
  0xa1   : > { %510 = vmatmul.mubr.msk.f32.vlgmr.msra.gmra.mrb[0].mxu1 %vm150_vm1, %v481_v16 }
 0x16f   : > { %v220_v17 = vpop.f32.mrb[0].mxu0 }
 0x170   : > { %225 = vst.msk [vmem:[%s134_s4] sm:$0xff] %vm224_vm5, %v220_v17  ;;  %v504_v18 = vpop.f32.mrb[1].mxu0 }
 0x173   : > { %v390_v19 = vpop.f32.mrb[2].mxu0 }
 0x174   : > { %v303_v20 = vpop.f32.mrb[0].mxu1  ;;  %v518_v21 = vpop.f32.mrb[3].mxu0 }
 0x175   : > { %308 = vrot.lane.b32.xlu1 %v303_v20, %s649_s5  ;;  %v511_v22 = vpop.f32.mrb[1].mxu1 }
 0x179   : > { %395 = vrot.lane.b32.xlu1 %v390_v19, %s650_s6 }
 0x1e7   : > { %v309_v23 = vpop.permute.xlu1 %308 }
 0x1e8   : > { %312 = vst.msk [vmem:[%s134_s4] sm:$0xff] %vm311_vm6, %v309_v23 }
 0x1eb   : > { %v396_v24 = vpop.permute.xlu1 %395 }
 0x1ec   : > { %399 = vst.msk [vmem:[%s134_s4] sm:$0xff] %vm398_vm7, %v396_v24 }
 0x1ed   : > { %592 = shalt.err (!%p589_p3)
}
 0x1ee   : > { %s593_s25 = scalar_lea.hbm %s734_s17, 128  ;;  %s597_s28 = scalar_lea.hbm %s778_s2, 256 }
 0x1ef   : > { %p594_p4 = scmp.ne.s32.totalorder %s734_s17, %s593_s25  ;;  %p598_p9 = scmp.lt.u32.totalorder %s734_s17, %s778_s2 }
 0x1f0   : > { %p599_p10 = scmp.lt.u32.totalorder %s597_s28, %s593_s25  ;;  %p601_p12 = scmp.lt.u32.totalorder %s593_s25, %s734_s17 }
 0x1f1   : > { %p595_p7 = pnand %p594_p4, %p705_p5 }
 0x1f2   : > { %p600_p11 = por %p599_p10, %p598_p9 }
 0x1f3   : > { %p596_p8 = pneg %p595_p7 }
 0x1f4   : > { %p602_p13 = por %p601_p12, %p600_p11 }
 0x1f6   : > { %p603_p0 = pnand %p602_p13, %p596_p8 }
 0x1f8   : > { %606 = shalt.err (!%p603_p0)
}
 0x1f9   : > { %528 = dma.vmem_to_hbm [thread:$0]  (%p705_p5), %s736_s8, 128, %s734_s17, %s401_s21  }
 0x1fa PF: > { %p534_p1 = scmp.ge.s32.totalorder %s641_s12, 2  ;;  %s426_s3 = sand.u32 1, %s629_s9  }
 0x1fb   : > { %s427_s4 = scalar_lea.sflag [#allocation3], %s426_s3 }
 0x1fc   : > { %p531_p2 = pnand %p534_p1, %p709_p6 }
 0x1fe   : > { %624 = dma.done.wait (!%p531_p2), %s427_s4, 128  }
 0x1ff   : > { %626 = vsyncadd (!%p531_p2), %s427_s4, 4294967168  ;;  %p12_p3 = scmp.ge.s32.totalorder %s692_s15, 4   ;;  %s781_s9 = smov %s633_s10 }
 0x200   : > { %s782_s10 = smov %s637_s11  ;;  %s783_s11 = smov %s703_s18 }
 0x201   : > { %s784_s12 = smov %s692_s15  ;;  %14 = sbr.rel (!%p12_p3) target bundleno = 3 (0x3), region = 63 }
 0x208   :  { %432 = vsyncpa [#allocation3], 1 }
 0x209   :  { %434 = vsyncpa [#allocation3 + $0x1], 1 }

</bundles_post_ra>
